<compile_context>
chip_gen: v6e
topology: v6e:2x2x1
jax: 0.10.0
libtpu: 0.0.40
codegen_flags: <defaults>
</compile_context>

<pallas_src>
import jax
import jax.numpy as jnp
from jax import lax
from jax.experimental import pallas as pl
from jax.experimental.pallas import tpu as pltpu

IN_F = 2
HID = 32
OUT_F = 1


def _round_up(a, m):
    return (a + m - 1) // m * m


def _make_kernel(chunk, n_chunks):
    def kernel(x_ref, w1_ref, b1_ref, w2_ref, b2_ref, w3_ref, b3_ref,
               w4_ref, b4_ref, o_ref):
        # x_ref: [IN_F, tile_b]  (batch on lanes); o_ref: [OUT_F, tile_b].
        # Hoist the (tiny) parameter loads out of the chunk loop.
        w1c0 = w1_ref[:, 0:1]          # [HID, 1]   f32
        w1c1 = w1_ref[:, 1:2]          # [HID, 1]   f32
        b1 = b1_ref[...]               # [HID, 1]   f32
        w2 = w2_ref[...]               # [HID, HID] bf16
        b2 = b2_ref[...]               # [HID, 1]   f32
        w3 = w3_ref[...]               # [HID, HID] bf16
        b3 = b3_ref[...]               # [HID, 1]   f32
        w4 = w4_ref[...]               # [OUT_F, HID] bf16
        b4 = b4_ref[...]               # [OUT_F, 1] f32

        def body(c, carry):
            col = pl.multiple_of(c * chunk, chunk)
            x = x_ref[:, pl.ds(col, chunk)]                      # [2, chunk] f32

            # Layer 1: Linear(2, 32) + ReLU on the VPU (K=2 would waste an MXU push).
            h = w1c0 * x[0:1, :] + w1c1 * x[1:2, :] + b1         # [HID, chunk]
            h = jnp.maximum(h, 0.0)
            # Dropout(0.5) is identity in eval mode.

            # Layer 2: Linear(32, 32) + ReLU (MXU, bf16 operands, f32 accumulate).
            h = jnp.dot(w2, h.astype(jnp.bfloat16),
                        preferred_element_type=jnp.float32) + b2
            h = jnp.maximum(h, 0.0)

            # Layer 3: Linear(32, 32) + ReLU (MXU).
            h = jnp.dot(w3, h.astype(jnp.bfloat16),
                        preferred_element_type=jnp.float32) + b3
            h = jnp.maximum(h, 0.0)

            # Output layer: Linear(32, 1) -> [1, chunk], lane-dense store.
            y = jnp.dot(w4, h.astype(jnp.bfloat16),
                        preferred_element_type=jnp.float32) + b4
            o_ref[:, pl.ds(col, chunk)] = y.astype(o_ref.dtype)
            return carry

        lax.fori_loop(0, n_chunks, body, 0, unroll=min(2, n_chunks))

    return kernel


def actuator_net2(x, params, *, tile_b=16384, chunk=512):
    """x: [B, 2] float32 (torch layout).  Returns [B, 1] float32."""
    B = x.shape[0]

    # Lane-dense tile (multiple of 128), clamped for small batches, and a
    # multiple of the inner chunk width so the chunk loop covers it exactly.
    tile_b = _round_up(min(tile_b, max(B, 1)), 128)
    chunk = min(chunk, tile_b)
    tile_b = _round_up(tile_b, chunk)
    n_chunks = tile_b // chunk
    n_tiles = max(pl.cdiv(B, tile_b), 1)
    B_pad = n_tiles * tile_b

    # Batch-on-lanes layout [IN_F, B_pad]; single fused transpose+pad (padded
    # columns only ever produce discarded outputs).
    x_t = x.T.astype(jnp.float32)
    if B_pad != B:
        x_t = jnp.pad(x_t, ((0, 0), (0, B_pad - B)))

    # Layer-1 weights stay f32 (VPU path); MXU layers get bf16 weights.
    w1 = params["w1"].astype(jnp.float32)                     # [32, 2]
    b1 = params["b1"].astype(jnp.float32).reshape(HID, 1)
    w2 = params["w2"].astype(jnp.bfloat16)                    # [32, 32]
    b2 = params["b2"].astype(jnp.float32).reshape(HID, 1)
    w3 = params["w3"].astype(jnp.bfloat16)                    # [32, 32]
    b3 = params["b3"].astype(jnp.float32).reshape(HID, 1)
    w4 = params["w4"].astype(jnp.bfloat16)                    # [1, 32]
    b4 = params["b4"].astype(jnp.float32).reshape(OUT_F, 1)

    param_bytes = int(sum(p.size * p.dtype.itemsize
                          for p in (w1, b1, w2, b2, w3, b3, w4, b4)))
    cost = pl.CostEstimate(
        flops=2 * B_pad * (IN_F * HID + 2 * HID * HID + HID * OUT_F),
        transcendentals=0,
        bytes_accessed=4 * B_pad * (IN_F + OUT_F) + param_bytes,
    )

    def const_spec(shape):
        return pl.BlockSpec(shape, lambda i: (0, 0))

    out_t = pl.pallas_call(
        _make_kernel(chunk, n_chunks),
        out_shape=jax.ShapeDtypeStruct((OUT_F, B_pad), jnp.float32),
        grid_spec=pltpu.PrefetchScalarGridSpec(
            num_scalar_prefetch=0,
            grid=(n_tiles,),
            in_specs=[
                pl.BlockSpec((IN_F, tile_b), lambda i: (0, i)),   # streaming x tile
                const_spec(w1.shape), const_spec(b1.shape),
                const_spec(w2.shape), const_spec(b2.shape),
                const_spec(w3.shape), const_spec(b3.shape),
                const_spec(w4.shape), const_spec(b4.shape),
            ],
            out_specs=pl.BlockSpec((OUT_F, tile_b), lambda i: (0, i)),
        ),
        compiler_params=pltpu.CompilerParams(
            dimension_semantics=("parallel",)),
        cost_estimate=cost,
    )(x_t, w1, b1, w2, b2, w3, b3, w4, b4)

    # [1, B_pad] -> [B, 1]
    return out_t[:, :B].T


def init_params(key):
    """Deterministic init matching nn.Linear shapes (PyTorch layout: W [out, in], b [out])."""
    ks = jax.random.split(key, 8)

    def linear(kw, kb, fan_in, fan_out):
        bound = 1.0 / jnp.sqrt(jnp.float32(fan_in))
        w = jax.random.uniform(kw, (fan_out, fan_in), jnp.float32, -bound, bound)
        b = jax.random.uniform(kb, (fan_out,), jnp.float32, -bound, bound)
        return w, b

    w1, b1 = linear(ks[0], ks[1], IN_F, HID)
    w2, b2 = linear(ks[2], ks[3], HID, HID)
    w3, b3 = linear(ks[4], ks[5], HID, HID)
    w4, b4 = linear(ks[6], ks[7], HID, OUT_F)
    return {"w1": w1, "b1": b1, "w2": w2, "b2": b2,
            "w3": w3, "b3": b3, "w4": w4, "b4": b4}


def reference_forward(x, p):
    h = jnp.maximum(x @ p["w1"].T + p["b1"], 0.0)
    h = jnp.maximum(h @ p["w2"].T + p["b2"], 0.0)
    h = jnp.maximum(h @ p["w3"].T + p["b3"], 0.0)
    return h @ p["w4"].T + p["b4"]


if __name__ == "__main__":
    key = jax.random.PRNGKey(0)
    k_params, k_x = jax.random.split(key)
    params = init_params(k_params)

    B = 8  # small batch; wrapper pads it up to one lane-dense tile
    x = jax.random.normal(k_x, (B, IN_F), jnp.float32)

    out = actuator_net2(x, params)
    out = jax.block_until_ready(out)

    ref = reference_forward(x, params)
    assert out.shape == (B, OUT_F)
    # Layers 2-4 run on the MXU with bf16 operands (f32 accumulation), so the
    # tolerance vs the pure-f32 reference is loosened accordingly.
    assert jnp.allclose(out, ref, atol=5e-2, rtol=5e-2), "mismatch vs JAX reference"

    print("KERNEL_OK")
</pallas_src>

<mosaic_0001>
module attributes {stable_mosaic.version = 11 : i64} {
  func.func @kernel(%arg0: i32, %arg1: memref<2x128xf32, #tpu.memory_space<vmem>>, %arg2: memref<32x2xf32, #tpu.memory_space<vmem>>, %arg3: memref<32x1xf32, #tpu.memory_space<vmem>>, %arg4: memref<32x32xbf16, #tpu.memory_space<vmem>>, %arg5: memref<32x1xf32, #tpu.memory_space<vmem>>, %arg6: memref<32x32xbf16, #tpu.memory_space<vmem>>, %arg7: memref<32x1xf32, #tpu.memory_space<vmem>>, %arg8: memref<1x32xbf16, #tpu.memory_space<vmem>>, %arg9: memref<1x1xf32, #tpu.memory_space<vmem>>, %arg10: memref<1x128xf32, #tpu.memory_space<vmem>>) attributes {dimension_semantics = [#tpu.dimension_semantics<parallel>], iteration_bounds = array<i64: 1>, scalar_prefetch = 0 : i64, scratch_operands = 0 : i64, tpu.core_type = #tpu.core_type<tc>, window_params = [{transform_indices = @transform_0, window_bounds = array<i64: 2, 128>}, {pipeline_mode = #tpu.pipeline_mode<synchronous>, transform_indices = @transform_1, window_bounds = array<i64: 32, 2>}, {pipeline_mode = #tpu.pipeline_mode<synchronous>, transform_indices = @transform_2, window_bounds = array<i64: 32, 1>}, {pipeline_mode = #tpu.pipeline_mode<synchronous>, transform_indices = @transform_3, window_bounds = array<i64: 32, 32>}, {pipeline_mode = #tpu.pipeline_mode<synchronous>, transform_indices = @transform_4, window_bounds = array<i64: 32, 1>}, {pipeline_mode = #tpu.pipeline_mode<synchronous>, transform_indices = @transform_5, window_bounds = array<i64: 32, 32>}, {pipeline_mode = #tpu.pipeline_mode<synchronous>, transform_indices = @transform_6, window_bounds = array<i64: 32, 1>}, {pipeline_mode = #tpu.pipeline_mode<synchronous>, transform_indices = @transform_7, window_bounds = array<i64: 1, 32>}, {pipeline_mode = #tpu.pipeline_mode<synchronous>, transform_indices = @transform_8, window_bounds = array<i64: 1, 1>}, {transform_indices = @transform_9, window_bounds = array<i64: 1, 128>}]} {
    %c0 = arith.constant 0 : index
    %c0_0 = arith.constant 0 : index
    %0 = vector.load %arg2[%c0, %c0_0] : memref<32x2xf32, #tpu.memory_space<vmem>>, vector<32x1xf32>
    %c0_1 = arith.constant 0 : index
    %c1 = arith.constant 1 : index
    %1 = vector.load %arg2[%c0_1, %c1] : memref<32x2xf32, #tpu.memory_space<vmem>>, vector<32x1xf32>
    %c0_2 = arith.constant 0 : index
    %c0_3 = arith.constant 0 : index
    %2 = vector.load %arg3[%c0_2, %c0_3] : memref<32x1xf32, #tpu.memory_space<vmem>>, vector<32x1xf32>
    %c0_4 = arith.constant 0 : index
    %c0_5 = arith.constant 0 : index
    %3 = vector.load %arg4[%c0_4, %c0_5] : memref<32x32xbf16, #tpu.memory_space<vmem>>, vector<32x32xbf16>
    %c0_6 = arith.constant 0 : index
    %c0_7 = arith.constant 0 : index
    %4 = vector.load %arg5[%c0_6, %c0_7] : memref<32x1xf32, #tpu.memory_space<vmem>>, vector<32x1xf32>
    %c0_8 = arith.constant 0 : index
    %c0_9 = arith.constant 0 : index
    %5 = vector.load %arg6[%c0_8, %c0_9] : memref<32x32xbf16, #tpu.memory_space<vmem>>, vector<32x32xbf16>
    %c0_10 = arith.constant 0 : index
    %c0_11 = arith.constant 0 : index
    %6 = vector.load %arg7[%c0_10, %c0_11] : memref<32x1xf32, #tpu.memory_space<vmem>>, vector<32x1xf32>
    %c0_12 = arith.constant 0 : index
    %c0_13 = arith.constant 0 : index
    %7 = vector.load %arg8[%c0_12, %c0_13] : memref<1x32xbf16, #tpu.memory_space<vmem>>, vector<1x32xbf16>
    %c0_14 = arith.constant 0 : index
    %c0_15 = arith.constant 0 : index
    %8 = vector.load %arg9[%c0_14, %c0_15] : memref<1x1xf32, #tpu.memory_space<vmem>>, vector<1x1xf32>
    %c0_i32 = arith.constant 0 : i32
    %c128_i32 = arith.constant 128 : i32
    %9 = arith.muli %c0_i32, %c128_i32 : i32
    %10 = tpu.assume_multiple %9, 128 : i32
    %c0_16 = arith.constant 0 : index
    %11 = arith.index_cast %10 : i32 to index
    %12 = vector.load %arg1[%c0_16, %11] : memref<2x128xf32, #tpu.memory_space<vmem>>, vector<2x128xf32>
    %13 = vector.extract_strided_slice %12 {offsets = [0, 0], sizes = [1, 128], strides = [1, 1]} : vector<2x128xf32> to vector<1x128xf32>
    %14 = vector.broadcast %0 : vector<32x1xf32> to vector<32x128xf32>
    %15 = vector.broadcast %13 : vector<1x128xf32> to vector<32x128xf32>
    %16 = arith.mulf %14, %15 : vector<32x128xf32>
    %17 = vector.extract_strided_slice %12 {offsets = [1, 0], sizes = [1, 128], strides = [1, 1]} : vector<2x128xf32> to vector<1x128xf32>
    %18 = vector.broadcast %1 : vector<32x1xf32> to vector<32x128xf32>
    %19 = vector.broadcast %17 : vector<1x128xf32> to vector<32x128xf32>
    %20 = arith.mulf %18, %19 : vector<32x128xf32>
    %21 = arith.addf %16, %20 : vector<32x128xf32>
    %22 = vector.broadcast %2 : vector<32x1xf32> to vector<32x128xf32>
    %23 = arith.addf %21, %22 : vector<32x128xf32>
    %cst = arith.constant 0.000000e+00 : f32
    %24 = vector.broadcast %cst : f32 to vector<32x128xf32>
    %25 = arith.maximumf %23, %24 : vector<32x128xf32>
    %26 = arith.truncf %25 : vector<32x128xf32> to vector<32x128xbf16>
    %cst_17 = arith.constant dense<0.000000e+00> : vector<32x128xf32>
    %27 = tpu.matmul %3, %26, %cst_17 {dimension_numbers = #tpu.dot_dimension_numbers<[1], [0], [0], [1], [0, 0, 1, 1], [], []>} : vector<32x32xbf16>, vector<32x128xbf16>, vector<32x128xf32> -> vector<32x128xf32>
    %28 = vector.broadcast %4 : vector<32x1xf32> to vector<32x128xf32>
    %29 = arith.addf %27, %28 : vector<32x128xf32>
    %cst_18 = arith.constant 0.000000e+00 : f32
    %30 = vector.broadcast %cst_18 : f32 to vector<32x128xf32>
    %31 = arith.maximumf %29, %30 : vector<32x128xf32>
    %32 = arith.truncf %31 : vector<32x128xf32> to vector<32x128xbf16>
    %cst_19 = arith.constant dense<0.000000e+00> : vector<32x128xf32>
    %33 = tpu.matmul %5, %32, %cst_19 {dimension_numbers = #tpu.dot_dimension_numbers<[1], [0], [0], [1], [0, 0, 1, 1], [], []>} : vector<32x32xbf16>, vector<32x128xbf16>, vector<32x128xf32> -> vector<32x128xf32>
    %34 = vector.broadcast %6 : vector<32x1xf32> to vector<32x128xf32>
    %35 = arith.addf %33, %34 : vector<32x128xf32>
    %cst_20 = arith.constant 0.000000e+00 : f32
    %36 = vector.broadcast %cst_20 : f32 to vector<32x128xf32>
    %37 = arith.maximumf %35, %36 : vector<32x128xf32>
    %38 = arith.truncf %37 : vector<32x128xf32> to vector<32x128xbf16>
    %cst_21 = arith.constant dense<0.000000e+00> : vector<1x128xf32>
    %39 = tpu.matmul %7, %38, %cst_21 {dimension_numbers = #tpu.dot_dimension_numbers<[1], [0], [0], [1], [0, 0, 1, 1], [], []>} : vector<1x32xbf16>, vector<32x128xbf16>, vector<1x128xf32> -> vector<1x128xf32>
    %40 = vector.broadcast %8 : vector<1x1xf32> to vector<1x128xf32>
    %41 = arith.addf %39, %40 : vector<1x128xf32>
    %c0_22 = arith.constant 0 : index
    %42 = arith.index_cast %10 : i32 to index
    %43 = vector.load %arg10[%c0_22, %42] : memref<1x128xf32, #tpu.memory_space<vmem>>, vector<1x128xf32>
    tpu.vector_store %arg10[%c0_22, %42], %41 {strides = array<i32>} : memref<1x128xf32, #tpu.memory_space<vmem>>, vector<1x128xf32>,
    %c1_i32 = arith.constant 1 : i32
    return
  }
  func.func @transform_0(%arg0: i32) -> (i32, i32) {
    %c0_i32 = arith.constant 0 : i32
    %c0_i32_0 = arith.constant 0 : i32
    return %c0_i32, %arg0 : i32, i32
  }
  func.func @transform_1(%arg0: i32) -> (i32, i32) {
    %c0_i32 = arith.constant 0 : i32
    %c0_i32_0 = arith.constant 0 : i32
    %c0_i32_1 = arith.constant 0 : i32
    return %c0_i32, %c0_i32_0 : i32, i32
  }
  func.func @transform_2(%arg0: i32) -> (i32, i32) {
    %c0_i32 = arith.constant 0 : i32
    %c0_i32_0 = arith.constant 0 : i32
    %c0_i32_1 = arith.constant 0 : i32
    return %c0_i32, %c0_i32_0 : i32, i32
  }
  func.func @transform_3(%arg0: i32) -> (i32, i32) {
    %c0_i32 = arith.constant 0 : i32
    %c0_i32_0 = arith.constant 0 : i32
    %c0_i32_1 = arith.constant 0 : i32
    return %c0_i32, %c0_i32_0 : i32, i32
  }
  func.func @transform_4(%arg0: i32) -> (i32, i32) {
    %c0_i32 = arith.constant 0 : i32
    %c0_i32_0 = arith.constant 0 : i32
    %c0_i32_1 = arith.constant 0 : i32
    return %c0_i32, %c0_i32_0 : i32, i32
  }
  func.func @transform_5(%arg0: i32) -> (i32, i32) {
    %c0_i32 = arith.constant 0 : i32
    %c0_i32_0 = arith.constant 0 : i32
    %c0_i32_1 = arith.constant 0 : i32
    return %c0_i32, %c0_i32_0 : i32, i32
  }
  func.func @transform_6(%arg0: i32) -> (i32, i32) {
    %c0_i32 = arith.constant 0 : i32
    %c0_i32_0 = arith.constant 0 : i32
    %c0_i32_1 = arith.constant 0 : i32
    return %c0_i32, %c0_i32_0 : i32, i32
  }
  func.func @transform_7(%arg0: i32) -> (i32, i32) {
    %c0_i32 = arith.constant 0 : i32
    %c0_i32_0 = arith.constant 0 : i32
    %c0_i32_1 = arith.constant 0 : i32
    return %c0_i32, %c0_i32_0 : i32, i32
  }
  func.func @transform_8(%arg0: i32) -> (i32, i32) {
    %c0_i32 = arith.constant 0 : i32
    %c0_i32_0 = arith.constant 0 : i32
    %c0_i32_1 = arith.constant 0 : i32
    return %c0_i32, %c0_i32_0 : i32, i32
  }
  func.func @transform_9(%arg0: i32) -> (i32, i32) {
    %c0_i32 = arith.constant 0 : i32
    %c0_i32_0 = arith.constant 0 : i32
    return %c0_i32, %arg0 : i32, i32
  }
}

</mosaic_0001>

<bundles_post_ra>
// kernel: tpu_custom_call.1
= control target key start
LH: loop header
LB: loop body
LE: loop exit
PB: predicated region body
PF: predicated region fallthrough
CT: control target
= control target key end

     0   :  { %s620_s0 = inlined_call_operand.vmem [shape: f32[2,128], index: 0, kind: input, shape index: {}]   ;;  %s621_s1 = inlined_call_operand.vmem [shape: f32[32,2], index: 1, kind: input, shape index: {}]   ;;  %s622_s2 = inlined_call_operand.vmem [shape: f32[32,1], index: 2, kind: input, shape index: {}]   ;;  %s623_s3 = inlined_call_operand.vmem [shape: bf16[32,32], index: 3, kind: input, shape index: {}]   ;;  %s624_s4 = inlined_call_operand.vmem [shape: f32[32,1], index: 4, kind: input, shape index: {}]   ;;  %s625_s5 = inlined_call_operand.vmem [shape: bf16[32,32], index: 5, kind: input, shape index: {}]   ;;  %s626_s6 = inlined_call_operand.vmem [shape: f32[32,1], index: 6, kind: input, shape index: {}]   ;;  %s627_s7 = inlined_call_operand.vmem [shape: bf16[1,32], index: 7, kind: input, shape index: {}]   ;;  %s628_s8 = inlined_call_operand.<no memory space> [shape: f32[1,1], index: 8, kind: input, shape index: {}]   ;;  %s629_s9 = inlined_call_operand.hbm [shape: f32[1,128], index: 9, kind: output, shape index: {}]  }
   0x1   :  { %v14_v0 = vstv %s628_s8 }
   0x2   :  { %15 = vst [vmem:[#allocation2] sm:$0x1] %v14_v0 }
   0x3   :  { %v38_v1 = vld [vmem:[%s621_s1 + $0x10] sm:$0xff]  ;;  %v36_v2 = vld [vmem:[%s621_s1] sm:$0xff]  ;;  %v480_v3 = vmov 1   ;;  %v39_v4 = vld [vmem:[%s621_s1 + $0x18] sm:$0xff]  ;;  %v481_v5 = vmov 0  }
   0x4   :  { %450 = vset.pattern.permute.xlu0 %v480_v3  ;;  %448 = vset.pattern.permute.xlu1 %v480_v3  ;;  %v37_v6 = vld [vmem:[%s621_s1 + $0x8] sm:$0xff] }
   0x5   :  { %100 = vperm.xlu1 %448, %v38_v1   ;;  %92 = vperm.xlu0 %450, %v36_v2  }
   0x9   :  { %104 = vperm.xlu1 %448, %v39_v4   ;;  %451 = vset.pattern.permute.xlu0 %v481_v5 }
   0xa   :  { %75 = vperm.xlu0 %451, %v38_v1  }
   0xb   :  { %16 = vsyncpa [#allocation4], 0  ;;  %v43_v7 = vld [vmem:[%s622_s2 + $0x18] sm:$0xff]  ;;  %v42_v8 = vld [vmem:[%s622_s2 + $0x10] sm:$0xff]  ;;  %vm179_vm0 = vcmask 261120   ;;  %v83_v21 = vlaneseq  ;;  %vm483_vm1 = vmmov 0  }
   0xc   :  { %v50_v9 = vld [vmem:[%s624_s4 + $0x10] sm:$0xff]  ;;  %v40_v10 = vld [vmem:[%s622_s2] sm:$0xff]  ;;  %v41_v12 = vld [vmem:[%s622_s2 + $0x8] sm:$0xff]  ;;  %s484_s24 = smov [#allocation3]  }
   0xd   :  { %449 = vset.pattern.permute.xlu1 %v481_v5  ;;  %v48_v11 = vld [vmem:[%s624_s4] sm:$0xff]  ;;  %v58_v13 = vld [vmem:[%s626_s6 + $0x10] sm:$0xff]  ;;  %v51_v14 = vld [vmem:[%s624_s4 + $0x18] sm:$0xff]  ;;  %v590_v24 = vshrl.u32 %v83_v21, 7  ;;  %s391_s25 = sshll.u32 %s484_s24, 4  ;;  %s392_s25 = int_to_ptr.vmem [resolvable:$true] %s391_s25 }
   0xe   :  { %70 = vperm.xlu1 %449, %v37_v6   ;;  %80 = vperm.xlu0 %451, %v39_v4   ;;  %v56_v15 = vld [vmem:[%s626_s6] sm:$0xff]  ;;  %v49_v17 = vld [vmem:[%s624_s4 + $0x8] sm:$0xff]  ;;  %v59_v19 = vld [vmem:[%s626_s6 + $0x18] sm:$0xff]  ;;  %s458_s26 = scalar_lea.vmem %s392_s25, 16  ;;  %s462_s27 = scalar_lea.vmem %s392_s25, 32 }
   0xf   :  { %v454_v16 = vld [vmem:[%s623_s3] sm:$0xff]   ;;  %v57_v20 = vld [vmem:[%s626_s6 + $0x8] sm:$0xff]  ;;  %v85_v27 = vsub.s32 0, %v590_v24  ;;  %v109_v28 = vsub.s32 1, %v590_v24  ;;  %p459_p0 = scmp.ne.s32.totalorder %s392_s25, %s458_s26  ;;  %p463_p1 = scmp.lt.s32.totalorder %s392_s25, %s392_s25 }
  0x10   :  { %423 = vmatprep.mubr.msk.bf16.mxu0 %vm179_vm0, %v454_v16  ;;  %v61_v18 = vld [vmem:[#allocation2] sm:$0x1]  ;;  %v455_v62 = vld [vmem:[%s623_s3 + $0x8] sm:$0xff]   ;;  %p464_p2 = scmp.lt.s32.totalorder %s462_s27, %s458_s26 }
  0x11   :  { %v62_v29 = vld [vmem:[%s620_s0] sm:$0x3] }
  0x12   :  { %452 = vset.pattern.permute.xlu1 %v480_v3  ;;  %65 = vperm.xlu0 %451, %v36_v2   ;;  %v86_v32 = vrot.slane %v62_v29, %v85_v27  ;;  %v110_v33 = vrot.slane %v62_v29, %v109_v28  ;;  %v456_v63 = vld [vmem:[%s625_s5] sm:$0xff]   ;;  %p465_p3 = por %p464_p2, %p463_p1 }
  0x13   :  { %96 = vperm.xlu1 %452, %v37_v6   ;;  %431 = vmatprep.mubr.msk.bf16.mxu1 %vm179_vm0, %v456_v63 }
  0x14   :  { %p466_p4 = pnand %p465_p3, %p459_p0 }
  0x16   :  { %136 = vperm.xlu0 %451, %v43_v7  }
  0x17   :  { %453 = vset.pattern.permute.xlu1 %v481_v5 }
  0x18   :  { %131 = vperm.xlu1 %453, %v42_v8  }
  0x1a   :  { %161 = vperm.xlu0 %451, %v50_v9  }
  0x1c   :  { %121 = vperm.xlu1 %453, %v40_v10  }
  0x1e   :  { %151 = vperm.xlu0 %451, %v48_v11  }
  0x20   :  { %126 = vperm.xlu1 %453, %v41_v12  }
  0x22   :  { %253 = vperm.xlu0 %451, %v58_v13  }
  0x24   :  { %166 = vperm.xlu1 %453, %v51_v14  }
  0x26   :  { %243 = vperm.xlu0 %451, %v56_v15  }
  0x28   :  { %156 = vperm.xlu1 %453, %v49_v17  }
  0x2a   :  { %334 = vperm.xlu0 %451, %v61_v18   ;;  %v457_v18 = vld [vmem:[%s625_s5 + $0x8] sm:$0xff]  }
  0x2c   :  { %258 = vperm.xlu1 %453, %v59_v19   ;;  %v482_v19 = vmov 0.0  }
  0x30   :  { %248 = vperm.xlu1 %453, %v57_v20  }
  0x80   :  { %v101_v22 = vpop.permute.xlu1 %100  ;;  %v93_v23 = vpop.permute.xlu0 %92 }
  0x81   :  { %v113_v39 = vmul.f32 %v110_v33, %v101_v22  ;;  %v111_v47 = vmul.f32 %v110_v33, %v93_v23 }
  0x84   :  { %v105_v25 = vpop.permute.xlu1 %104 }
  0x85   :  { %v76_v26 = vpop.permute.xlu0 %75  ;;  %v114_v36 = vmul.f32 %v110_v33, %v105_v25 }
  0x86   :  { %v89_v37 = vmul.f32 %v86_v32, %v76_v26 }
  0x88   :  { %v117_v43 = vadd.f32 %v113_v39, %v89_v37 }
  0x89   :  { %v71_v30 = vpop.permute.xlu1 %70  ;;  %v81_v31 = vpop.permute.xlu0 %80 }
  0x8a   :  { %v90_v34 = vmul.f32 %v86_v32, %v81_v31  ;;  %v88_v52 = vmul.f32 %v86_v32, %v71_v30 }
  0x8c   :  { %v118_v40 = vadd.f32 %v114_v36, %v90_v34 }
  0x8d   :  { %v66_v35 = vpop.permute.xlu0 %65 }
  0x8e   :  { %v97_v38 = vpop.permute.xlu1 %96  ;;  %v87_v45 = vmul.f32 %v86_v32, %v66_v35 }
  0x8f   :  { %v112_v48 = vmul.f32 %v110_v33, %v97_v38 }
  0x90   :  { %v115_v53 = vadd.f32 %v111_v47, %v87_v45 }
  0x91   :  { %v137_v41 = vpop.permute.xlu0 %136  ;;  %v116_v56 = vadd.f32 %v112_v48, %v88_v52 }
  0x92   :  { %v142_v42 = vadd.f32 %v137_v41, %v118_v40  ;;  %v60_v40 = vld [vmem:[%s627_s7] sm:$0x1] }
  0x93   :  { %v132_v44 = vpop.permute.xlu1 %131 }
  0x94   :  { %v141_v46 = vadd.f32 %v132_v44, %v117_v43  ;;  %v146_v49 = vmax.f32 %v142_v42, 0.0 }
  0x95   :  { %v162_v0 = vpop.permute.xlu0 %161 }
  0x96   :  { %v145_v50 = vmax.f32 %v141_v46, 0.0 }
  0x97   :  { %v122_v51 = vpop.permute.xlu1 %121 }
  0x98   :  { %v148_v54 = vpack.c.bf16 %v146_v49, %v145_v50  ;;  %v139_v55 = vadd.f32 %v122_v51, %v115_v53 }
  0x99   :  { %v152_v5 = vpop.permute.xlu0 %151 }
  0x9a   :  { %419 = vmatprep.subr.bf16.mxu0 %v148_v54  ;;  %v143_v59 = vmax.f32 %v139_v55, 0.0 }
  0x9b   :  { %v127_v57 = vpop.permute.xlu1 %126  ;;  %420 = vmatpush3.bf16.msra.mxu0 %v148_v54 }
  0x9c   :  { %v140_v58 = vadd.f32 %v127_v57, %v116_v56 }
  0x9d   :  { %v254_v20 = vpop.permute.xlu0 %253 }
  0x9e   :  { %v144_v60 = vmax.f32 %v140_v58, 0.0 }
  0x9f   :  { %v167_v1 = vpop.permute.xlu1 %166 }
  0xa0   :  { %v147_v61 = vpack.c.bf16 %v144_v60, %v143_v59 }
  0xa1   :  { %v244_v28 = vpop.permute.xlu0 %243 }
  0xa2   :  { %421 = vmatprep.subr.bf16.mxu0 %v147_v61 }
  0xa3   :  { %422 = vmatpush3.bf16.msra.mxu0 %v147_v61  ;;  %v157_v9 = vpop.permute.xlu1 %156 }
  0xa4   :  { %435 = vmatprep.subr.bf16.mxu0 %v482_v19 }
  0xa5   :  { %v335_v41 = vpop.permute.xlu0 %334 }
  0xa6   :  { %424 = vmatmul.mubr.msk.bf16.vlgmr.msra.gmra.mxu0 %vm179_vm0, %v455_v62  ;;  %v340_v42 = vrot.slane %v335_v41, %v85_v27 }
  0xa7   :  { %439 = vmatprep.mubr.msk.bf16.mxu0 %vm483_vm1, %v482_v19  ;;  %v259_v21 = vpop.permute.xlu1 %258 }
  0xab   :  { %v249_v30 = vpop.permute.xlu1 %248 }
 0x166   :  { %v425_v2 = vpop.f32.mrf.mxu0 }
 0x167   :  { %v229_v4 = vadd.f32 %v425_v2, %v162_v0 }
 0x168   :  { %v220_v3 = vpop.f32.mrf.mxu0 }
 0x169   :  { %v221_v7 = vadd.f32 %v220_v3, %v152_v5  ;;  %v237_v11 = vmax.f32 %v229_v4, 0.0 }
 0x16a   :  { %v426_v6 = vpop.f32.mrf.mxu0 }
 0x16b   :  { %v232_v8 = vadd.f32 %v426_v6, %v167_v1  ;;  %v235_v14 = vmax.f32 %v221_v7, 0.0 }
 0x16c   :  { %v223_v10 = vpop.f32.mrf.mxu0 }
 0x16d   :  { %v238_v12 = vmax.f32 %v232_v8, 0.0  ;;  %v224_v13 = vadd.f32 %v223_v10, %v157_v9 }
 0x16f   :  { %v236_v15 = vmax.f32 %v224_v13, 0.0  ;;  %v240_v16 = vpack.c.bf16 %v238_v12, %v237_v11 }
 0x171   :  { %v239_v17 = vpack.c.bf16 %v236_v15, %v235_v14  ;;  %427 = vmatprep.subr.bf16.mxu1 %v240_v16 }
 0x172   :  { %428 = vmatpush3.bf16.msra.mxu1 %v240_v16 }
 0x173   :  { %429 = vmatprep.subr.bf16.mxu1 %v239_v17 }
 0x176   :  { %430 = vmatpush3.bf16.msra.mxu1 %v239_v17 }
 0x179   :  { %432 = vmatmul.mubr.msk.bf16.vlgmr.msra.gmra.mxu1 %vm179_vm0, %v457_v18 }
 0x239   :  { %v433_v22 = vpop.f32.mrf.mxu1 }
 0x23a   :  { %v320_v25 = vadd.f32 %v433_v22, %v254_v20 }
 0x23b   :  { %v311_v23 = vpop.f32.mrf.mxu1 }
 0x23c   :  { %v328_v32 = vmax.f32 %v320_v25, 0.0  ;;  %v312_v33 = vadd.f32 %v311_v23, %v244_v28 }
 0x23d   :  { %v434_v26 = vpop.f32.mrf.mxu1 }
 0x23e   :  { %v323_v29 = vadd.f32 %v434_v26, %v259_v21  ;;  %v326_v38 = vmax.f32 %v312_v33, 0.0 }
 0x23f   :  { %v314_v31 = vpop.f32.mrf.mxu1 }
 0x240   :  { %v329_v34 = vmax.f32 %v323_v29, 0.0  ;;  %v315_v35 = vadd.f32 %v314_v31, %v249_v30 }
 0x242   :  { %v331_v36 = vpack.c.bf16 %v329_v34, %v328_v32  ;;  %v327_v37 = vmax.f32 %v315_v35, 0.0 }
 0x244   :  { %436 = vmatpush3.bf16.msra.mxu0 %v331_v36  ;;  %v330_v39 = vpack.c.bf16 %v327_v37, %v326_v38 }
 0x245   :  { %437 = vmatprep.subr.bf16.mxu0 %v482_v19 }
 0x248   :  { %438 = vmatpush3.bf16.msra.mxu0 %v330_v39 }
 0x24b   :  { %440 = vmatmul.mubr.msk.bf16.vlgmr.msra.gmra.mxu0 %vm179_vm0, %v60_v40 }
 0x30b   :  { %v378_v43 = vpop.f32.mrf.mxu0 }
 0x30c   :  { %v379_v44 = vadd.f32 %v378_v43, %v340_v42 }
 0x30d   :  { %v441_v45 = vpop.f32.mrf.mxu0 }
 0x30e   :  { %384 = vst [vmem:[#allocation3] sm:$0x1] %v379_v44 }
 0x30f   :  { %v381_v46 = vpop.f32.mrf.mxu0 }
 0x310   :  { %469 = shalt.err (!%p466_p4)
}
 0x311   :  { %394 = dma.vmem_to_hbm [thread:$0]  %s392_s25, 16, %s629_s9, [#allocation4]   ;;  %v442_v24 = vpop.f32.mrf.mxu0 }
 0x312   :  { %478 = dma.done.wait [#allocation4], 16  }
 0x313   :  { %479 = vsyncadd [#allocation4], 4294967280 }
 0x314   :  { %398 = vsyncpa [#allocation4], 1 }

</bundles_post_ra>
